<compile_context>
chip_gen: v6e
topology: v6e:2x2x1
jax: 0.10.0
libtpu: 0.0.40
codegen_flags: <defaults>
</compile_context>

<pallas_src>
import jax
import jax.numpy as jnp
from jax.experimental import pallas as pl
from jax.experimental.pallas import tpu as pltpu


def _softmax_c_kernel(x_ref, o_ref):
    # Block: (Bt, C, T).  C lives on sublanes, the spatial tile T is lane-dense.
    # NOTE: padded lanes / padded batch rows of a partial block contain stale
    # VMEM; exp on them may produce inf/NaN, but all reductions here are over
    # the C axis only (never across lanes / batch rows) and padded regions are
    # never written back, so this is benign.  Do NOT add cross-lane reductions.
    x = x_ref[...]
    m = jnp.max(x, axis=1, keepdims=True)                 # (Bt, 1, T)  XLU-free-ish
    e = jnp.exp((x - m).astype(jnp.float32))              # cast only before exp:
                                                          # no full f32 block copy for bf16
    s = jnp.sum(e, axis=1, keepdims=True)                 # (Bt, 1, T)
    o_ref[...] = (e / s).astype(o_ref.dtype)              # exact divide: HBM-bound, free


def _choose_blocks(b, c, hw, itemsize, ws_budget):
    """Pick (Bt, tile) block dims for a (B, C, HW) softmax-over-C stream.

    Byte-budgeted: per-block working set ~= 2*in + 2*out double buffers plus
    ~2 block-sized f32 temporaries, i.e. ~ Bt*c_pad*lanes*(4*itemsize + 8)
    bytes.  Accounts for sublane padding of C and keeps >= 2 grid steps when
    there is enough data for the v7x megacore to shard.
    """
    sub = max(8, 32 // itemsize)                # sublane pack: 8 f32 / 16 bf16 / 32 int8
    c_pad = -(-c // sub) * sub                  # real VMEM rows per plane
    per_slot = 4 * itemsize + 8                 # bytes of working set per element slot
    lane_budget = max(128, ws_budget // (c_pad * per_slot))

    hw_lanes = -(-hw // 128) * 128              # VMEM lane footprint of the full HW axis

    if hw_lanes <= lane_budget:
        # Whole spatial extent fits in one block -> fold batch rows into the block.
        tile = hw                               # full-extent last dim (always legal)
        bt = max(1, min(b, lane_budget // hw_lanes))
        # Megacore: keep >= 2 grid steps if there's enough data to be worth sharding.
        total_bytes = b * c_pad * hw_lanes * itemsize
        if bt >= b and total_bytes > (4 << 20):
            if b >= 2:
                bt = -(-b // 2)                 # -> 2 batch blocks
            elif hw >= 256:
                bt = 1
                tile = max(128, ((-(-hw // 2)) // 128) * 128)   # -> >=2 spatial blocks
        return bt, tile

    # Spatial axis must be split: 128-aligned tile (< hw), one batch row per block.
    tile = max(128, (lane_budget // 128) * 128)
    return 1, tile


def softmax_layer(x, *, ws_budget_bytes=None):
    """Equivalent of SoftmaxLayer.forward: softmax over the channel axis of NCHW x."""
    b, c, h, w = x.shape
    hw = h * w
    itemsize = jnp.dtype(x.dtype).itemsize

    # Generation-aware VMEM budget (v7x: 64 MiB physical; v5e/v6e: 128 MiB).
    try:
        vmem_cap = int(pltpu.get_tpu_info().vmem_capacity_bytes)
    except Exception:
        vmem_cap = 64 << 20                     # conservative (v7x) fallback
    ws_budget = ws_budget_bytes or min(int(vmem_cap * 0.45), 48 << 20)
    vmem_limit = min(vmem_cap * 3 // 4, 96 << 20)

    bt, tile = _choose_blocks(b, c, hw, itemsize, ws_budget)
    grid = (pl.cdiv(b, bt), pl.cdiv(hw, tile))

    x3 = x.reshape(b, c, hw)                    # contiguous view — no HBM round trip

    # Advisory only; ignores C-sublane padding in the HBM layout (slight undercount).
    n_elems = b * c * hw
    cost = pl.CostEstimate(
        flops=5 * n_elems,                      # sub, max, sum, div (+slack)
        transcendentals=n_elems,                # exp
        bytes_accessed=2 * n_elems * itemsize,  # read + write
    )

    y3 = pl.pallas_call(
        _softmax_c_kernel,
        out_shape=jax.ShapeDtypeStruct((b, c, hw), x.dtype),
        grid=grid,
        in_specs=[pl.BlockSpec((bt, c, tile), lambda bi, si: (bi, 0, si))],
        out_specs=pl.BlockSpec((bt, c, tile), lambda bi, si: (bi, 0, si)),
        compiler_params=pltpu.CompilerParams(
            dimension_semantics=("parallel", "parallel"),
            vmem_limit_bytes=int(vmem_limit),
        ),
        cost_estimate=cost,
    )(x3)

    return y3.reshape(b, c, h, w)


if __name__ == "__main__":
    key = jax.random.PRNGKey(0)

    # Main check: shapes implied by the module (NCHW, small).
    B, C, H, W = 2, 4, 16, 16
    x = jax.random.normal(key, (B, C, H, W), dtype=jnp.float32)

    y = jax.block_until_ready(softmax_layer(x))
    ref = jax.nn.softmax(x, axis=1)

    assert y.shape == (B, C, H, W)
    assert y.dtype == x.dtype
    # Exact divide now -> tight tolerances vs the reference.
    assert jnp.allclose(y, ref, atol=1e-6, rtol=1e-6), "mismatch vs reference"
    assert jnp.allclose(jnp.sum(y, axis=1), 1.0, atol=1e-5), "columns don't sum to 1"

    # Ragged spatial shape (hw = 300, not a multiple of 128): full-extent
    # last-dim block + batch folding path.
    x2 = jax.random.normal(jax.random.PRNGKey(1), (2, 4, 15, 20), dtype=jnp.float32)
    y2 = jax.block_until_ready(softmax_layer(x2))
    ref2 = jax.nn.softmax(x2, axis=1)
    assert jnp.allclose(y2, ref2, atol=1e-6, rtol=1e-6), "mismatch on ragged shape"

    # Force the spatial-split path (small working-set budget) so the partial
    # last block (padded lanes) is exercised: hw = 4620, tile = 512 -> 10 steps.
    x3 = jax.random.normal(jax.random.PRNGKey(2), (1, 4, 60, 77), dtype=jnp.float32)
    y3 = jax.block_until_ready(softmax_layer(x3, ws_budget_bytes=8 * 24 * 512))
    ref3 = jax.nn.softmax(x3, axis=1)
    assert jnp.allclose(y3, ref3, atol=1e-6, rtol=1e-6), "mismatch on split path"

    # TODO(synk): optional bf16 exp path for v7x bf16 inputs (only generation
    # where mem-bound rate approaches EUP throughput); f32 kept elsewhere.

    print("KERNEL_OK")
</pallas_src>

<mosaic_0001>
module attributes {stable_mosaic.version = 11 : i64} {
  func.func @_softmax_c_kernel(%arg0: i32, %arg1: i32, %arg2: memref<2x4x256xf32, #tpu.memory_space<vmem>>, %arg3: memref<2x4x256xf32, #tpu.memory_space<vmem>>) attributes {dimension_semantics = [#tpu.dimension_semantics<parallel>, #tpu.dimension_semantics<parallel>], iteration_bounds = array<i64: 1, 1>, scalar_prefetch = 0 : i64, scratch_operands = 0 : i64, tpu.core_type = #tpu.core_type<tc>, window_params = [{transform_indices = @transform_0, window_bounds = array<i64: 2, 4, 256>}, {transform_indices = @transform_1, window_bounds = array<i64: 2, 4, 256>}]} {
    %c0 = arith.constant 0 : index
    %c0_0 = arith.constant 0 : index
    %c0_1 = arith.constant 0 : index
    %0 = vector.load %arg2[%c0, %c0_0, %c0_1] : memref<2x4x256xf32, #tpu.memory_space<vmem>>, vector<2x4x256xf32>
    %cst = arith.constant dense<0xFF800000> : vector<2x256xf32>
    %1 = vector.multi_reduction <maximumf>, %0, %cst [1] : vector<2x4x256xf32> to vector<2x256xf32>
    %2 = vector.shape_cast %1 : vector<2x256xf32> to vector<2x1x256xf32>
    %3 = vector.broadcast %2 : vector<2x1x256xf32> to vector<2x4x256xf32>
    %4 = arith.subf %0, %3 : vector<2x4x256xf32>
    %5 = math.exp %4 : vector<2x4x256xf32>
    %cst_2 = arith.constant dense<0.000000e+00> : vector<2x256xf32>
    %6 = vector.multi_reduction <add>, %5, %cst_2 [1] : vector<2x4x256xf32> to vector<2x256xf32>
    %7 = vector.shape_cast %6 : vector<2x256xf32> to vector<2x1x256xf32>
    %8 = vector.broadcast %7 : vector<2x1x256xf32> to vector<2x4x256xf32>
    %9 = arith.divf %5, %8 : vector<2x4x256xf32>
    %c0_3 = arith.constant 0 : index
    %c0_4 = arith.constant 0 : index
    %c0_5 = arith.constant 0 : index
    %10 = vector.load %arg3[%c0_3, %c0_4, %c0_5] : memref<2x4x256xf32, #tpu.memory_space<vmem>>, vector<2x4x256xf32>
    tpu.vector_store %arg3[%c0_3, %c0_4, %c0_5], %9 {strides = array<i32>} : memref<2x4x256xf32, #tpu.memory_space<vmem>>, vector<2x4x256xf32>,
    return
  }
  func.func @transform_0(%arg0: i32, %arg1: i32) -> (i32, i32, i32) {
    %c0_i32 = arith.constant 0 : i32
    %c0_i32_0 = arith.constant 0 : i32
    return %arg0, %c0_i32, %arg1 : i32, i32, i32
  }
  func.func @transform_1(%arg0: i32, %arg1: i32) -> (i32, i32, i32) {
    %c0_i32 = arith.constant 0 : i32
    %c0_i32_0 = arith.constant 0 : i32
    return %arg0, %c0_i32, %arg1 : i32, i32, i32
  }
}

</mosaic_0001>

<bundles_post_ra>
// kernel: tpu_custom_call.1
= control target key start
LH: loop header
LB: loop body
LE: loop exit
PB: predicated region body
PF: predicated region fallthrough
CT: control target
= control target key end

     0   :  { %6 = vsyncpa [#allocation3], 0  ;;  %s231_s0 = inlined_call_operand.hbm [shape: f32[2,4,256], index: 0, kind: input, shape index: {}]   ;;  %s232_s1 = inlined_call_operand.hbm [shape: f32[2,4,256], index: 1, kind: output, shape index: {}]  }
   0x1   :  { %7 = vsyncpa [#allocation4], 0  ;;  %s197_s6 = smov [#allocation2]  }
   0x2   :  { %s13_s7 = sshll.u32 %s197_s6, 4  ;;  %s14_s7 = int_to_ptr.vmem [resolvable:$true] %s13_s7 }
   0x3   :  { %s161_s8 = scalar_lea.vmem %s14_s7, 256  ;;  %p166_p1 = scmp.lt.s32.totalorder %s14_s7, %s14_s7 }
   0x4   :  { %p162_p0 = scmp.ne.s32.totalorder %s14_s7, %s161_s8  ;;  %p167_p2 = scmp.lt.s32.totalorder %s161_s8, %s161_s8 }
   0x6   :  { %p168_p3 = por %p167_p2, %p166_p1 }
   0x8   :  { %p169_p4 = pnand %p168_p3, %p162_p0 }
   0xa   :  { %172 = shalt.err (!%p169_p4)
}
   0xb   :  { %s198_s9 = smov 128   ;;  %s199_s10 = smov 8  }
   0xc   :  { %19 = dma.hbm_to_vmem [thread:$0]  %s231_s0, 256, %s14_s7, [#allocation3], %s198_s9, %s198_s9, %s199_s10  }
   0xd   :  { %193 = dma.done.wait [#allocation3], 256  }
   0xe   :  { %194 = vsyncadd [#allocation3], 4294967040  ;;  %vm31_vm0 = vcmask 1043456   ;;  %v23_v0 = vld [vmem:[#allocation2] sm:$0xff]  ;;  %v24_v1 = vld [vmem:[#allocation2 + $0x8] sm:$0xff]  ;;  %s200_s0 = smov [#allocation5]  }
   0xf   :  { %v27_v2 = vcombine.high %v23_v0, %v23_v0  ;;  %v32_v3 = vsel %vm31_vm0, %v23_v0, -inf  ;;  %v28_v4 = vcombine.high %v24_v1, %v24_v1  ;;  %v46_v5 = vsel %vm31_vm0, %v24_v1, -inf  ;;  %s127_s13 = sshll.u32 %s200_s0, 4  ;;  %s128_s13 = int_to_ptr.vmem [resolvable:$true] %s127_s13 }
  0x10   :  { %v33_v6 = vrot.slane %v32_v3, 4  ;;  %v47_v7 = vrot.slane %v46_v5, 4  ;;  %s173_s14 = scalar_lea.vmem %s128_s13, 256  ;;  %p178_p6 = scmp.lt.s32.totalorder %s128_s13, %s128_s13 }
  0x11   :  { %v39_v8 = vsel %vm31_vm0, %v27_v2, -inf  ;;  %v53_v9 = vsel %vm31_vm0, %v28_v4, -inf  ;;  %p174_p5 = scmp.ne.s32.totalorder %s128_s13, %s173_s14  ;;  %p179_p7 = scmp.lt.s32.totalorder %s173_s14, %s173_s14 }
  0x12   :  { %v34_v10 = vmax.f32 %v32_v3, %v33_v6  ;;  %v40_v11 = vrot.slane %v39_v8, 4  ;;  %v48_v12 = vmax.f32 %v46_v5, %v47_v7  ;;  %v54_v13 = vrot.slane %v53_v9, 4 }
  0x13   :  { %p180_p8 = por %p179_p7, %p178_p6 }
  0x14   :  { %v35_v14 = vrot.slane %v34_v10, 2  ;;  %v41_v15 = vmax.f32 %v39_v8, %v40_v11  ;;  %v49_v16 = vrot.slane %v48_v12, 2  ;;  %v55_v17 = vmax.f32 %v53_v9, %v54_v13 }
  0x15   :  { %p181_p9 = pnand %p180_p8, %p174_p5 }
  0x16   :  { %v36_v18 = vmax.f32 %v34_v10, %v35_v14  ;;  %v42_v19 = vrot.slane %v41_v15, 2  ;;  %v50_v20 = vmax.f32 %v48_v12, %v49_v16  ;;  %v56_v21 = vrot.slane %v55_v17, 2 }
  0x18   :  { %v37_v22 = vrot.slane %v36_v18, 1  ;;  %v43_v23 = vmax.f32 %v41_v15, %v42_v19  ;;  %v51_v24 = vrot.slane %v50_v20, 1  ;;  %v57_v25 = vmax.f32 %v55_v17, %v56_v21 }
  0x1a   :  { %v38_v26 = vmax.f32 %v36_v18, %v37_v22  ;;  %v44_v27 = vrot.slane %v43_v23, 1  ;;  %v52_v28 = vmax.f32 %v50_v20, %v51_v24  ;;  %v58_v29 = vrot.slane %v57_v25, 1 }
  0x1c   :  { %v45_v30 = vmax.f32 %v43_v23, %v44_v27  ;;  %v59_v31 = vmax.f32 %v57_v25, %v58_v29 }
  0x1e   :  { %v64_v32 = vcombine.low %v38_v26, %v45_v30  ;;  %v65_v33 = vcombine.low %v52_v28, %v59_v31 }
  0x20   :  { %v68_v34 = vsub.f32 %v23_v0, %v64_v32  ;;  %v69_v35 = vsub.f32 %v24_v1, %v65_v33 }
  0x22   :  { %v70_v36 = vmul.f32 1.442695, %v68_v34  ;;  %v72_v37 = vmul.f32 1.442695, %v69_v35 }
  0x24   :  { %145 = vpow2.f32 %v70_v36 }
  0x25   :  { %147 = vpow2.f32 %v72_v37 }
  0x31   :  { %v146_v38 = vpop.eup %145 }
  0x32   :  { %v148_v39 = vpop.eup %147  ;;  %v76_v40 = vcombine.high %v146_v38, %v146_v38  ;;  %v80_v41 = vsel %vm31_vm0, %v146_v38, 0.0 }
  0x33   :  { %v81_v42 = vrot.slane %v80_v41, 4  ;;  %v77_v43 = vcombine.high %v148_v39, %v148_v39  ;;  %v94_v44 = vsel %vm31_vm0, %v148_v39, 0.0 }
  0x34   :  { %v87_v45 = vsel %vm31_vm0, %v76_v40, 0.0  ;;  %v95_v46 = vrot.slane %v94_v44, 4 }
  0x35   :  { %v82_v47 = vadd.f32 %v81_v42, %v80_v41  ;;  %v88_v48 = vrot.slane %v87_v45, 4  ;;  %v101_v49 = vsel %vm31_vm0, %v77_v43, 0.0 }
  0x36   :  { %v96_v50 = vadd.f32 %v95_v46, %v94_v44  ;;  %v102_v51 = vrot.slane %v101_v49, 4 }
  0x37   :  { %v83_v52 = vrot.slane %v82_v47, 2  ;;  %v89_v53 = vadd.f32 %v88_v48, %v87_v45 }
  0x38   :  { %v97_v54 = vrot.slane %v96_v50, 2  ;;  %v103_v55 = vadd.f32 %v102_v51, %v101_v49 }
  0x39   :  { %v84_v56 = vadd.f32 %v83_v52, %v82_v47  ;;  %v90_v57 = vrot.slane %v89_v53, 2 }
  0x3a   :  { %v98_v58 = vadd.f32 %v97_v54, %v96_v50  ;;  %v104_v59 = vrot.slane %v103_v55, 2 }
  0x3b   :  { %v85_v60 = vrot.slane %v84_v56, 1  ;;  %v91_v61 = vadd.f32 %v90_v57, %v89_v53 }
  0x3c   :  { %v99_v62 = vrot.slane %v98_v58, 1  ;;  %v105_v63 = vadd.f32 %v104_v59, %v103_v55 }
  0x3d   :  { %v86_v0 = vadd.f32 %v85_v60, %v84_v56  ;;  %v92_v1 = vrot.slane %v91_v61, 1 }
  0x3e   :  { %v100_v2 = vadd.f32 %v99_v62, %v98_v58  ;;  %v106_v3 = vrot.slane %v105_v63, 1 }
  0x3f   :  { %v93_v4 = vadd.f32 %v92_v1, %v91_v61 }
  0x40   :  { %v107_v5 = vadd.f32 %v106_v3, %v105_v63 }
  0x41   :  { %v112_v6 = vcombine.low %v86_v0, %v93_v4 }
  0x42   :  { %v113_v7 = vcombine.low %v100_v2, %v107_v5 }
  0x43   :  { %149 = vrcp.f32 %v112_v6 }
  0x44   :  { %151 = vrcp.f32 %v113_v7 }
  0x50   :  { %v150_v8 = vpop.eup %149 }
  0x51   :  { %v152_v9 = vpop.eup %151  ;;  %v117_v10 = vmul.f32 %v150_v8, %v146_v38 }
  0x52   :  { %v119_v11 = vmul.f32 %v152_v9, %v148_v39 }
  0x53   :  { %120 = vst [vmem:[#allocation5] sm:$0xff] %v117_v10 }
  0x54   :  { %121 = vst [vmem:[#allocation5 + $0x8] sm:$0xff] %v119_v11 }
  0x55   :  { %184 = shalt.err (!%p181_p9)
}
  0x56   :  { %133 = dma.vmem_to_hbm [thread:$0]  %s128_s13, 256, %s232_s1, [#allocation4], %s198_s9, %s198_s9, %s199_s10  }
  0x57   :  { %195 = dma.done.wait [#allocation4], 256  }
  0x58   :  { %196 = vsyncadd [#allocation4], 4294967040 }
  0x59   :  { %137 = vsyncpa [#allocation3], 1 }
  0x5a   :  { %138 = vsyncpa [#allocation4], 1 }

</bundles_post_ra>
